<compile_context>
chip_gen: v7x
topology: tpu7x:2x2x1
jax: 0.10.0
libtpu: 0.0.40
codegen_flags: <defaults>
</compile_context>

<pallas_src>
from functools import partial
from typing import NamedTuple, Optional, Tuple

import numpy as np
import jax
import jax.numpy as jnp
from jax import lax
from jax.experimental import pallas as pl
from jax.experimental.pallas import tpu as pltpu


# ------------------------------ static config -------------------------------

class _LayerCfg(NamedTuple):
    H: int            # conv input/output height ('same', stride 1)
    W: int            # conv input/output width
    K: int            # square kernel size
    Ci: int
    Co: int
    plo: int          # top/left padding  ((K-1)//2)
    phi: int          # bottom/right padding (K-1-plo)
    pool: Optional[int]   # nearest-upsample factor after this conv (None = final)
    final: bool


class _DecoderCfg(NamedTuple):
    B: int
    latent: int
    l: int
    layers: Tuple[_LayerCfg, ...]


def _build_cfg(B, latent_dim, pool_list, chan, kernel_size, flatten_len):
    l = int(np.sqrt(latent_dim))
    assert l * l == latent_dim, "latent_dim must be a perfect square"
    assert flatten_len % (l * l) == 0
    n_layer = len(pool_list)
    C0 = flatten_len // (l * l)
    layers = []
    H = W = l
    for i in range(n_layer + 1):
        final = i == n_layer
        Ci = C0 if i == 0 else chan[i - 1]
        Co = 1 if final else chan[i]
        K = kernel_size[i] if i < len(kernel_size) else kernel_size[-1]
        # TODO(synk): padding='same' with an even kernel size pads asymmetrically
        # in PyTorch; only odd kernel sizes are exercised/validated here.
        plo = (K - 1) // 2
        phi = K - 1 - plo
        pool = None if final else int(pool_list[i])
        layers.append(_LayerCfg(H=H, W=W, K=K, Ci=Ci, Co=Co, plo=plo, phi=phi,
                                pool=pool, final=final))
        if not final:
            H, W = H * pool, W * pool
    return _DecoderCfg(B=B, latent=latent_dim, l=l, layers=tuple(layers))


# ----------------------- host-side (weight-only) prep -----------------------

def _prepare_packed(params, cfg):
    """Build the kernel's matmul operands and pack them into ONE 2-D slab.

    Only (tiny) weights are touched here, never activations.  Every operand is
    placed at an 8-row-aligned offset; widths are zero-padded to a common lane
    width.  Returns (wpack, layout) with layout[name] = (row_off, rows, cols).
    """
    l = cfg.l
    L0 = cfg.layers[0]
    C0 = L0.Ci
    latent = params["lin_w"].shape[0]
    Wp0 = L0.W + L0.K - 1

    mats = []

    # Linear: torch reshape order of the output columns is (c, y, x); reorder to
    # (y, x, c) and pre-pad the x axis with the layer-0 lane halo, so each lin
    # row chunk is directly a full padded row of the layer-0 halo scratch.
    lw = params["lin_w"].reshape(latent, C0, l, l).transpose(0, 2, 3, 1)
    lw = jnp.pad(lw, ((0, 0), (0, 0), (L0.plo, L0.phi), (0, 0)))
    mats.append(("lin_w", lw.reshape(latent, l * Wp0 * C0)))
    lb = params["lin_b"].reshape(C0, l, l).transpose(1, 2, 0)
    lb = jnp.pad(lb, ((0, 0), (L0.plo, L0.phi), (0, 0)))
    mats.append(("lin_b", lb.reshape(1, l * Wp0 * C0)))

    for i, L in enumerate(cfg.layers):
        K, Ci, Co, W = L.K, L.Ci, L.Co, L.W
        Wp = W + K - 1
        # stacked tap matrix: rows indexed (kh, w', ci), cols (w, co):
        #   T[(kh, w', ci), (w, co)] = w_hwio[kh, w'-w, ci, co]  (0 outside)
        wp_idx = np.arange(Wp)[:, None]
        wo_idx = np.arange(W)[None, :]
        kw = wp_idx - wo_idx
        valid = jnp.asarray(((kw >= 0) & (kw < K)).astype(np.float32))  # (Wp, W)
        kw_c = np.clip(kw, 0, K - 1)
        w_hwio = params["conv_w"][i]                                    # (K,K,Ci,Co)
        taps = []
        for kh in range(K):
            t = w_hwio[kh][kw_c, :, :] * valid[:, :, None, None]        # (Wp,W,Ci,Co)
            taps.append(jnp.transpose(t, (0, 2, 1, 3)).reshape(Wp * Ci, W * Co))
        mats.append((f"taps{i}", jnp.concatenate(taps, axis=0)))        # (K*Wp*Ci, W*Co)
        mats.append((f"bias{i}",
                     jnp.tile(params["conv_b"][i].reshape(1, Co), (1, W))))

        if L.pool is not None:
            # lane-axis nearest upsample fused with the NEXT layer's lane halo:
            # (w, co) -> (x', ci) with x' = plo_next + xo, xo // s = w, ci = co.
            s = L.pool
            nxt = cfg.layers[i + 1]
            Wn, Kn, pn = nxt.W, nxt.K, nxt.plo
            Wpn = Wn + Kn - 1
            M = np.zeros((W * Co, Wpn * Co), np.float32)
            for xo in range(Wn):
                w_src = xo // s
                for c in range(Co):
                    M[w_src * Co + c, (pn + xo) * Co + c] = 1.0
            mats.append((f"uw{i}", jnp.asarray(M)))

    width = max(int(m.shape[1]) for _, m in mats)
    layout = {}
    parts = []
    off = 0
    for name, m in mats:
        r, c = int(m.shape[0]), int(m.shape[1])
        rp = -(-r // 8) * 8                       # 8-row (sublane) alignment
        layout[name] = (off, r, c)
        parts.append(jnp.pad(m, ((0, rp - r), (0, width - c))))
        off += rp
    wpack = jnp.concatenate(parts, axis=0)        # (total_rows, width) f32
    return wpack, layout


# ------------------------------- fused kernel -------------------------------

def _decoder_kernel(x_ref, w_ref, o_ref, *pad_refs, cfg, layout, mm_dtype):
    Bt = x_ref.shape[0]
    l = cfg.l

    def slab(name):
        off, r, c = layout[name]
        return w_ref[off:off + r, 0:c]

    def mm(a, b):
        return jnp.dot(a.astype(mm_dtype), b.astype(mm_dtype),
                       preferred_element_type=jnp.float32)

    # ---- fused Linear: columns pre-ordered (y, x', c) and lane-halo padded ----
    lin = mm(x_ref[:, 0, :], slab("lin_w")) + slab("lin_b")   # (Bt, l*Wp0*C0)

    L0 = cfg.layers[0]
    Wl0 = (L0.W + L0.K - 1) * L0.Ci
    Hp0 = L0.H + L0.K - 1
    pad0 = pad_refs[0]
    if L0.plo:                                   # zero only the halo rows
        pad0[:, 0:L0.plo, :] = jnp.zeros((Bt, L0.plo, Wl0), jnp.float32)
    if L0.phi:
        pad0[:, L0.plo + L0.H:Hp0, :] = jnp.zeros((Bt, L0.phi, Wl0), jnp.float32)
    # NOTE: per-row stores kept on purpose — a (Bt, l*Wp0*C0) -> (Bt, l, Wp0*C0)
    # reshape would force an XLU relayout.
    for y in range(l):
        pad0[:, L0.plo + y, :] = lin[:, y * Wl0:(y + 1) * Wl0]

    # ---- conv (+ ReLU + fused nearest-upsample) layers, all in VMEM ----
    for i, L in enumerate(cfg.layers):
        pad = pad_refs[i]
        H, W, K, Ci, Co = L.H, L.W, L.K, L.Ci, L.Co
        Wl = (W + K - 1) * Ci

        # im2col over kh along the lane axis -> ONE MXU matmul per layer
        lhs = jnp.concatenate([pad[:, kh:kh + H, :] for kh in range(K)],
                              axis=-1).reshape(Bt * H, K * Wl)
        acc = mm(lhs, slab(f"taps{i}")) + slab(f"bias{i}")    # (Bt*H, W*Co)

        if L.final:
            # acc already has the output layout (Bt*Hf, Wf) — no reshape.
            o_ref[...] = jax.nn.sigmoid(acc)
        else:
            act = jnp.maximum(acc, 0.0)
            s = L.pool
            nxt = cfg.layers[i + 1]
            Wln = (nxt.W + nxt.K - 1) * nxt.Ci
            Hpn = nxt.H + nxt.K - 1
            npad = pad_refs[i + 1]
            # lane-axis nearest upsample (exact 0/1 matmul) fused with the next
            # layer's left/right lane halo -> rows are already full padded rows.
            up = mm(act, slab(f"uw{i}")).reshape(Bt, H, Wln)
            if nxt.plo:
                npad[:, 0:nxt.plo, :] = jnp.zeros((Bt, nxt.plo, Wln), jnp.float32)
            if nxt.phi:
                npad[:, nxt.plo + nxt.H:Hpn, :] = (
                    jnp.zeros((Bt, nxt.phi, Wln), jnp.float32))
            # row-axis nearest upsample: H broadcast slice-stores (no O(B^2) matrix)
            for y in range(H):
                npad[:, nxt.plo + y * s: nxt.plo + (y + 1) * s, :] = (
                    jnp.broadcast_to(up[:, y:y + 1, :], (Bt, s, Wln)))


# --------------------------------- wrapper -----------------------------------

def _vmem_budget_bytes():
    try:
        kind = jax.devices()[0].device_kind.lower()
    except Exception:
        kind = ""
    if "v5" in kind or "v6" in kind:
        return 48 << 20          # 128 MiB physical VMEM: allow bigger batch blocks
    return 20 << 20              # v7x (64 MiB physical / 32 MiB scoped) & default


def _pick_batch_block(B, per_b_bytes, Hf, budget):
    cap = max(1, budget // max(1, 3 * per_b_bytes))
    # divisors of B whose output block keeps an 8-aligned sublane dim
    divs = [d for d in range(1, B + 1)
            if B % d == 0 and ((d * Hf) % 8 == 0 or d == B)]
    fit = [d for d in divs if d <= cap] or [divs[0]]
    bt = fit[-1]
    # prefer >= 2 grid steps so v7x's two TensorCores both get work
    if B // bt < 2 and len(fit) >= 2:
        bt = fit[-2]
    return bt


def decoder_forward(params, x, *, latent_dim, pool_list,
                    matmul_dtype=jnp.float32, batch_block=None):
    B = x.shape[0]
    flatten_len = params["lin_w"].shape[1]
    kernel_size = [int(w.shape[0]) for w in params["conv_w"]]
    chan = [int(w.shape[3]) for w in params["conv_w"][:-1]]
    cfg = _build_cfg(B, latent_dim, list(pool_list), chan, kernel_size, flatten_len)
    wpack, layout = _prepare_packed(params, cfg)

    Hf, Wf = cfg.layers[-1].H, cfg.layers[-1].W
    per_b = 4 * (sum((L.H + L.K - 1) * (L.W + L.K - 1) * L.Ci for L in cfg.layers)
                 + latent_dim + Hf * Wf)
    budget = _vmem_budget_bytes()
    Bt = batch_block if batch_block is not None else _pick_batch_block(B, per_b, Hf, budget)
    assert B % Bt == 0
    grid = (B // Bt,)

    scratch = [pltpu.VMEM((Bt, L.H + L.K - 1, (L.W + L.K - 1) * L.Ci), jnp.float32)
               for L in cfg.layers]

    vmem_need = 3 * Bt * per_b + 4 * int(wpack.size) + (1 << 20)
    vmem_limit = int(max(32 << 20, min(2 * vmem_need, 2 * budget)))

    x3 = x.reshape(B, 1, latent_dim)
    out = pl.pallas_call(
        partial(_decoder_kernel, cfg=cfg, layout=layout, mm_dtype=matmul_dtype),
        out_shape=jax.ShapeDtypeStruct((B * Hf, Wf), jnp.float32),
        grid=grid,
        in_specs=[pl.BlockSpec((Bt, 1, latent_dim), lambda b: (b, 0, 0)),
                  pl.BlockSpec(wpack.shape, lambda b: (0, 0))],   # one packed DMA
        out_specs=pl.BlockSpec((Bt * Hf, Wf), lambda b: (b, 0)),
        scratch_shapes=scratch,
        compiler_params=pltpu.CompilerParams(
            dimension_semantics=("parallel",),
            vmem_limit_bytes=vmem_limit),
    )(x3, wpack)
    # (B*Hf, Wf) -> (B, 1, Hf, Wf): contiguous, metadata-only reshape.
    return out.reshape(B, 1, Hf, Wf)


# --------------------------- pure-JAX reference ------------------------------

def decoder_reference(params, x, *, latent_dim, pool_list):
    h = x @ params["lin_w"] + params["lin_b"][0]
    l = int(np.sqrt(latent_dim))
    B = x.shape[0]
    C0 = h.shape[1] // (l * l)
    h = h.reshape(B, C0, l, l)                                    # NCHW
    dn = ("NCHW", "HWIO", "NCHW")
    n_layer = len(pool_list)
    for i in range(n_layer):
        w, b = params["conv_w"][i], params["conv_b"][i]
        h = lax.conv_general_dilated(h, w, (1, 1), "SAME", dimension_numbers=dn)
        h = jnp.maximum(h + b[0].reshape(1, -1, 1, 1), 0.0)
        s = pool_list[i]
        h = jnp.repeat(jnp.repeat(h, s, axis=2), s, axis=3)
    w, b = params["conv_w"][-1], params["conv_b"][-1]
    h = lax.conv_general_dilated(h, w, (1, 1), "SAME", dimension_numbers=dn)
    return jax.nn.sigmoid(h + b[0].reshape(1, -1, 1, 1))


# ------------------------------- params --------------------------------------

def init_params(key, *, chan, n_layer, kernel_size, latent_dim, flatten_len):
    n_conv = n_layer + 1
    keys = jax.random.split(key, 2 + 2 * n_conv)
    params = {
        "lin_w": 0.1 * jax.random.normal(keys[0], (latent_dim, flatten_len), jnp.float32),
        "lin_b": 0.1 * jax.random.normal(keys[1], (1, flatten_len), jnp.float32),
        "conv_w": [],
        "conv_b": [],
    }
    for i in range(n_conv):
        cin = chan[0] if i == 0 else chan[i - 1]
        cout = chan[i] if i < n_layer else 1
        k = kernel_size[i] if i < len(kernel_size) else kernel_size[-1]
        params["conv_w"].append(
            0.1 * jax.random.normal(keys[2 + 2 * i], (k, k, cin, cout), jnp.float32))
        params["conv_b"].append(
            0.1 * jax.random.normal(keys[3 + 2 * i], (1, cout), jnp.float32))
    return params


if __name__ == "__main__":
    # Small config consistent with the module:
    chan = [4, 4]
    n_layer = 2
    kernel_size = [3, 3, 3]
    latent_dim = 16                      # l = 4
    pool_list = [2, 2]
    flatten_len = chan[0] * 4 * 4        # 64  (reshapes to (B, chan[0], 4, 4))

    key = jax.random.PRNGKey(0)
    pkey, xkey = jax.random.split(key)
    params = init_params(pkey, chan=chan, n_layer=n_layer, kernel_size=kernel_size,
                         latent_dim=latent_dim, flatten_len=flatten_len)

    x = jax.random.normal(xkey, (2, latent_dim), jnp.float32)

    fwd = jax.jit(partial(decoder_forward, latent_dim=latent_dim,
                          pool_list=tuple(pool_list)))
    out = jax.block_until_ready(fwd(params, x))
    assert out.shape == (2, 1, 16, 16), out.shape

    ref = jax.block_until_ready(
        decoder_reference(params, x, latent_dim=latent_dim, pool_list=pool_list))
    np.testing.assert_allclose(np.asarray(out), np.asarray(ref), rtol=1e-5, atol=1e-5)

    print("KERNEL_OK")
</pallas_src>

<mosaic_0001>
module attributes {stable_mosaic.version = 11 : i64} {
  func.func @_decoder_kernel(%arg0: i32, %arg1: memref<1x1x16xf32, #tpu.memory_space<vmem>>, %arg2: memref<504x96xf32, #tpu.memory_space<vmem>>, %arg3: memref<16x16xf32, #tpu.memory_space<vmem>>, %arg4: memref<1x6x24xf32, #tpu.memory_space<vmem>>, %arg5: memref<1x10x40xf32, #tpu.memory_space<vmem>>, %arg6: memref<1x18x72xf32, #tpu.memory_space<vmem>>) attributes {dimension_semantics = [#tpu.dimension_semantics<parallel>], iteration_bounds = array<i64: 2>, scalar_prefetch = 0 : i64, scratch_operands = 3 : i64, tpu.core_type = #tpu.core_type<tc>, window_params = [{transform_indices = @transform_0, window_bounds = array<i64: 1, 1, 16>}, {pipeline_mode = #tpu.pipeline_mode<synchronous>, transform_indices = @transform_1, window_bounds = array<i64: 504, 96>}, {transform_indices = @transform_2, window_bounds = array<i64: 16, 16>}]} {
    %c0 = arith.constant 0 : index
    %c0_0 = arith.constant 0 : index
    %c0_1 = arith.constant 0 : index
    %0 = vector.load %arg1[%c0, %c0_0, %c0_1] : memref<1x1x16xf32, #tpu.memory_space<vmem>>, vector<1x1x16xf32>
    %1 = vector.shape_cast %0 : vector<1x1x16xf32> to vector<1x16xf32>
    %c0_2 = arith.constant 0 : index
    %c0_3 = arith.constant 0 : index
    %2 = vector.load %arg2[%c0_2, %c0_3] : memref<504x96xf32, #tpu.memory_space<vmem>>, vector<16x96xf32>
    %cst = arith.constant dense<0.000000e+00> : vector<1x96xf32>
    %3 = tpu.matmul %1, %2, %cst {dimension_numbers = #tpu.dot_dimension_numbers<[1], [0], [0], [1], [0, 0, 1, 1], [], []>} : vector<1x16xf32>, vector<16x96xf32>, vector<1x96xf32> -> vector<1x96xf32>
    %c16 = arith.constant 16 : index
    %c0_4 = arith.constant 0 : index
    %4 = vector.load %arg2[%c16, %c0_4] : memref<504x96xf32, #tpu.memory_space<vmem>>, vector<1x96xf32>
    %5 = arith.addf %3, %4 : vector<1x96xf32>
    %cst_5 = arith.constant 0.000000e+00 : f32
    %6 = vector.broadcast %cst_5 : f32 to vector<1x1x24xf32>
    %c0_6 = arith.constant 0 : index
    %c0_7 = arith.constant 0 : index
    %c0_8 = arith.constant 0 : index
    %7 = vector.load %arg4[%c0_6, %c0_7, %c0_8] : memref<1x6x24xf32, #tpu.memory_space<vmem>>, vector<1x1x24xf32>
    tpu.vector_store %arg4[%c0_6, %c0_7, %c0_8], %6 {strides = array<i32>} : memref<1x6x24xf32, #tpu.memory_space<vmem>>, vector<1x1x24xf32>,
    %cst_9 = arith.constant 0.000000e+00 : f32
    %8 = vector.broadcast %cst_9 : f32 to vector<1x1x24xf32>
    %c0_10 = arith.constant 0 : index
    %c5 = arith.constant 5 : index
    %c0_11 = arith.constant 0 : index
    %9 = vector.load %arg4[%c0_10, %c5, %c0_11] : memref<1x6x24xf32, #tpu.memory_space<vmem>>, vector<1x1x24xf32>
    tpu.vector_store %arg4[%c0_10, %c5, %c0_11], %8 {strides = array<i32>} : memref<1x6x24xf32, #tpu.memory_space<vmem>>, vector<1x1x24xf32>,
    %10 = vector.extract_strided_slice %5 {offsets = [0, 0], sizes = [1, 24], strides = [1, 1]} : vector<1x96xf32> to vector<1x24xf32>
    %c0_12 = arith.constant 0 : index
    %c1 = arith.constant 1 : index
    %c0_13 = arith.constant 0 : index
    %11 = vector.load %arg4[%c0_12, %c1, %c0_13] : memref<1x6x24xf32, #tpu.memory_space<vmem>>, vector<1x1x24xf32>
    %12 = vector.shape_cast %11 : vector<1x1x24xf32> to vector<1x24xf32>
    %13 = vector.shape_cast %10 : vector<1x24xf32> to vector<1x1x24xf32>
    tpu.vector_store %arg4[%c0_12, %c1, %c0_13], %13 {strides = array<i32>} : memref<1x6x24xf32, #tpu.memory_space<vmem>>, vector<1x1x24xf32>,
    %14 = vector.extract_strided_slice %5 {offsets = [0, 24], sizes = [1, 24], strides = [1, 1]} : vector<1x96xf32> to vector<1x24xf32>
    %c0_14 = arith.constant 0 : index
    %c2 = arith.constant 2 : index
    %c0_15 = arith.constant 0 : index
    %15 = vector.load %arg4[%c0_14, %c2, %c0_15] : memref<1x6x24xf32, #tpu.memory_space<vmem>>, vector<1x1x24xf32>
    %16 = vector.shape_cast %15 : vector<1x1x24xf32> to vector<1x24xf32>
    %17 = vector.shape_cast %14 : vector<1x24xf32> to vector<1x1x24xf32>
    tpu.vector_store %arg4[%c0_14, %c2, %c0_15], %17 {strides = array<i32>} : memref<1x6x24xf32, #tpu.memory_space<vmem>>, vector<1x1x24xf32>,
    %18 = vector.extract_strided_slice %5 {offsets = [0, 48], sizes = [1, 24], strides = [1, 1]} : vector<1x96xf32> to vector<1x24xf32>
    %c0_16 = arith.constant 0 : index
    %c3 = arith.constant 3 : index
    %c0_17 = arith.constant 0 : index
    %19 = vector.load %arg4[%c0_16, %c3, %c0_17] : memref<1x6x24xf32, #tpu.memory_space<vmem>>, vector<1x1x24xf32>
    %20 = vector.shape_cast %19 : vector<1x1x24xf32> to vector<1x24xf32>
    %21 = vector.shape_cast %18 : vector<1x24xf32> to vector<1x1x24xf32>
    tpu.vector_store %arg4[%c0_16, %c3, %c0_17], %21 {strides = array<i32>} : memref<1x6x24xf32, #tpu.memory_space<vmem>>, vector<1x1x24xf32>,
    %22 = vector.extract_strided_slice %5 {offsets = [0, 72], sizes = [1, 24], strides = [1, 1]} : vector<1x96xf32> to vector<1x24xf32>
    %c0_18 = arith.constant 0 : index
    %c4 = arith.constant 4 : index
    %c0_19 = arith.constant 0 : index
    %23 = vector.load %arg4[%c0_18, %c4, %c0_19] : memref<1x6x24xf32, #tpu.memory_space<vmem>>, vector<1x1x24xf32>
    %24 = vector.shape_cast %23 : vector<1x1x24xf32> to vector<1x24xf32>
    %25 = vector.shape_cast %22 : vector<1x24xf32> to vector<1x1x24xf32>
    tpu.vector_store %arg4[%c0_18, %c4, %c0_19], %25 {strides = array<i32>} : memref<1x6x24xf32, #tpu.memory_space<vmem>>, vector<1x1x24xf32>,
    %c0_20 = arith.constant 0 : index
    %c0_21 = arith.constant 0 : index
    %c0_22 = arith.constant 0 : index
    %26 = vector.load %arg4[%c0_20, %c0_21, %c0_22] : memref<1x6x24xf32, #tpu.memory_space<vmem>>, vector<1x4x24xf32>
    %c0_23 = arith.constant 0 : index
    %c1_24 = arith.constant 1 : index
    %c0_25 = arith.constant 0 : index
    %27 = vector.load %arg4[%c0_23, %c1_24, %c0_25] : memref<1x6x24xf32, #tpu.memory_space<vmem>>, vector<1x4x24xf32>
    %c0_26 = arith.constant 0 : index
    %c2_27 = arith.constant 2 : index
    %c0_28 = arith.constant 0 : index
    %28 = vector.load %arg4[%c0_26, %c2_27, %c0_28] : memref<1x6x24xf32, #tpu.memory_space<vmem>>, vector<1x4x24xf32>
    %29 = tpu.concatenate %26, %27, %28 in 2 : vector<1x4x24xf32>, vector<1x4x24xf32>, vector<1x4x24xf32> -> vector<1x4x72xf32>
    %30 = vector.shape_cast %29 : vector<1x4x72xf32> to vector<4x72xf32>
    %c24 = arith.constant 24 : index
    %c0_29 = arith.constant 0 : index
    %31 = vector.load %arg2[%c24, %c0_29] : memref<504x96xf32, #tpu.memory_space<vmem>>, vector<72x16xf32>
    %cst_30 = arith.constant dense<0.000000e+00> : vector<4x16xf32>
    %32 = tpu.matmul %30, %31, %cst_30 {dimension_numbers = #tpu.dot_dimension_numbers<[1], [0], [0], [1], [0, 0, 1, 1], [], []>} : vector<4x72xf32>, vector<72x16xf32>, vector<4x16xf32> -> vector<4x16xf32>
    %c96 = arith.constant 96 : index
    %c0_31 = arith.constant 0 : index
    %33 = vector.load %arg2[%c96, %c0_31] : memref<504x96xf32, #tpu.memory_space<vmem>>, vector<1x16xf32>
    %34 = vector.broadcast %33 : vector<1x16xf32> to vector<4x16xf32>
    %35 = arith.addf %32, %34 : vector<4x16xf32>
    %cst_32 = arith.constant 0.000000e+00 : f32
    %36 = vector.broadcast %cst_32 : f32 to vector<4x16xf32>
    %37 = arith.maximumf %35, %36 : vector<4x16xf32>
    %c104 = arith.constant 104 : index
    %c0_33 = arith.constant 0 : index
    %38 = vector.load %arg2[%c104, %c0_33] : memref<504x96xf32, #tpu.memory_space<vmem>>, vector<16x40xf32>
    %cst_34 = arith.constant dense<0.000000e+00> : vector<4x40xf32>
    %39 = tpu.matmul %37, %38, %cst_34 {dimension_numbers = #tpu.dot_dimension_numbers<[1], [0], [0], [1], [0, 0, 1, 1], [], []>} : vector<4x16xf32>, vector<16x40xf32>, vector<4x40xf32> -> vector<4x40xf32>
    %40 = vector.shape_cast %39 : vector<4x40xf32> to vector<1x4x40xf32>
    %cst_35 = arith.constant 0.000000e+00 : f32
    %41 = vector.broadcast %cst_35 : f32 to vector<1x1x40xf32>
    %c0_36 = arith.constant 0 : index
    %c0_37 = arith.constant 0 : index
    %c0_38 = arith.constant 0 : index
    %42 = vector.load %arg5[%c0_36, %c0_37, %c0_38] : memref<1x10x40xf32, #tpu.memory_space<vmem>>, vector<1x1x40xf32>
    tpu.vector_store %arg5[%c0_36, %c0_37, %c0_38], %41 {strides = array<i32>} : memref<1x10x40xf32, #tpu.memory_space<vmem>>, vector<1x1x40xf32>,
    %cst_39 = arith.constant 0.000000e+00 : f32
    %43 = vector.broadcast %cst_39 : f32 to vector<1x1x40xf32>
    %c0_40 = arith.constant 0 : index
    %c9 = arith.constant 9 : index
    %c0_41 = arith.constant 0 : index
    %44 = vector.load %arg5[%c0_40, %c9, %c0_41] : memref<1x10x40xf32, #tpu.memory_space<vmem>>, vector<1x1x40xf32>
    tpu.vector_store %arg5[%c0_40, %c9, %c0_41], %43 {strides = array<i32>} : memref<1x10x40xf32, #tpu.memory_space<vmem>>, vector<1x1x40xf32>,
    %45 = vector.extract_strided_slice %40 {offsets = [0, 0, 0], sizes = [1, 1, 40], strides = [1, 1, 1]} : vector<1x4x40xf32> to vector<1x1x40xf32>
    %46 = vector.shape_cast %45 : vector<1x1x40xf32> to vector<1x1x40xf32>
    %47 = vector.broadcast %46 : vector<1x1x40xf32> to vector<1x2x40xf32>
    %c0_42 = arith.constant 0 : index
    %c1_43 = arith.constant 1 : index
    %c0_44 = arith.constant 0 : index
    %48 = vector.load %arg5[%c0_42, %c1_43, %c0_44] : memref<1x10x40xf32, #tpu.memory_space<vmem>>, vector<1x2x40xf32>
    tpu.vector_store %arg5[%c0_42, %c1_43, %c0_44], %47 {strides = array<i32>} : memref<1x10x40xf32, #tpu.memory_space<vmem>>, vector<1x2x40xf32>,
    %49 = vector.extract_strided_slice %40 {offsets = [0, 1, 0], sizes = [1, 1, 40], strides = [1, 1, 1]} : vector<1x4x40xf32> to vector<1x1x40xf32>
    %50 = vector.shape_cast %49 : vector<1x1x40xf32> to vector<1x1x40xf32>
    %51 = vector.broadcast %50 : vector<1x1x40xf32> to vector<1x2x40xf32>
    %c0_45 = arith.constant 0 : index
    %c3_46 = arith.constant 3 : index
    %c0_47 = arith.constant 0 : index
    %52 = vector.load %arg5[%c0_45, %c3_46, %c0_47] : memref<1x10x40xf32, #tpu.memory_space<vmem>>, vector<1x2x40xf32>
    tpu.vector_store %arg5[%c0_45, %c3_46, %c0_47], %51 {strides = array<i32>} : memref<1x10x40xf32, #tpu.memory_space<vmem>>, vector<1x2x40xf32>,
    %53 = vector.extract_strided_slice %40 {offsets = [0, 2, 0], sizes = [1, 1, 40], strides = [1, 1, 1]} : vector<1x4x40xf32> to vector<1x1x40xf32>
    %54 = vector.shape_cast %53 : vector<1x1x40xf32> to vector<1x1x40xf32>
    %55 = vector.broadcast %54 : vector<1x1x40xf32> to vector<1x2x40xf32>
    %c0_48 = arith.constant 0 : index
    %c5_49 = arith.constant 5 : index
    %c0_50 = arith.constant 0 : index
    %56 = vector.load %arg5[%c0_48, %c5_49, %c0_50] : memref<1x10x40xf32, #tpu.memory_space<vmem>>, vector<1x2x40xf32>
    tpu.vector_store %arg5[%c0_48, %c5_49, %c0_50], %55 {strides = array<i32>} : memref<1x10x40xf32, #tpu.memory_space<vmem>>, vector<1x2x40xf32>,
    %57 = vector.extract_strided_slice %40 {offsets = [0, 3, 0], sizes = [1, 1, 40], strides = [1, 1, 1]} : vector<1x4x40xf32> to vector<1x1x40xf32>
    %58 = vector.shape_cast %57 : vector<1x1x40xf32> to vector<1x1x40xf32>
    %59 = vector.broadcast %58 : vector<1x1x40xf32> to vector<1x2x40xf32>
    %c0_51 = arith.constant 0 : index
    %c7 = arith.constant 7 : index
    %c0_52 = arith.constant 0 : index
    %60 = vector.load %arg5[%c0_51, %c7, %c0_52] : memref<1x10x40xf32, #tpu.memory_space<vmem>>, vector<1x2x40xf32>
    tpu.vector_store %arg5[%c0_51, %c7, %c0_52], %59 {strides = array<i32>} : memref<1x10x40xf32, #tpu.memory_space<vmem>>, vector<1x2x40xf32>,
    %c0_53 = arith.constant 0 : index
    %c0_54 = arith.constant 0 : index
    %c0_55 = arith.constant 0 : index
    %61 = vector.load %arg5[%c0_53, %c0_54, %c0_55] : memref<1x10x40xf32, #tpu.memory_space<vmem>>, vector<1x8x40xf32>
    %c0_56 = arith.constant 0 : index
    %c1_57 = arith.constant 1 : index
    %c0_58 = arith.constant 0 : index
    %62 = vector.load %arg5[%c0_56, %c1_57, %c0_58] : memref<1x10x40xf32, #tpu.memory_space<vmem>>, vector<1x8x40xf32>
    %c0_59 = arith.constant 0 : index
    %c2_60 = arith.constant 2 : index
    %c0_61 = arith.constant 0 : index
    %63 = vector.load %arg5[%c0_59, %c2_60, %c0_61] : memref<1x10x40xf32, #tpu.memory_space<vmem>>, vector<1x8x40xf32>
    %64 = tpu.concatenate %61, %62, %63 in 2 : vector<1x8x40xf32>, vector<1x8x40xf32>, vector<1x8x40xf32> -> vector<1x8x120xf32>
    %65 = vector.shape_cast %64 : vector<1x8x120xf32> to vector<8x120xf32>
    %c120 = arith.constant 120 : index
    %c0_62 = arith.constant 0 : index
    %66 = vector.load %arg2[%c120, %c0_62] : memref<504x96xf32, #tpu.memory_space<vmem>>, vector<120x32xf32>
    %cst_63 = arith.constant dense<0.000000e+00> : vector<8x32xf32>
    %67 = tpu.matmul %65, %66, %cst_63 {dimension_numbers = #tpu.dot_dimension_numbers<[1], [0], [0], [1], [0, 0, 1, 1], [], []>} : vector<8x120xf32>, vector<120x32xf32>, vector<8x32xf32> -> vector<8x32xf32>
    %c240 = arith.constant 240 : index
    %c0_64 = arith.constant 0 : index
    %68 = vector.load %arg2[%c240, %c0_64] : memref<504x96xf32, #tpu.memory_space<vmem>>, vector<1x32xf32>
    %69 = vector.broadcast %68 : vector<1x32xf32> to vector<8x32xf32>
    %70 = arith.addf %67, %69 : vector<8x32xf32>
    %cst_65 = arith.constant 0.000000e+00 : f32
    %71 = vector.broadcast %cst_65 : f32 to vector<8x32xf32>
    %72 = arith.maximumf %70, %71 : vector<8x32xf32>
    %c248 = arith.constant 248 : index
    %c0_66 = arith.constant 0 : index
    %73 = vector.load %arg2[%c248, %c0_66] : memref<504x96xf32, #tpu.memory_space<vmem>>, vector<32x72xf32>
    %cst_67 = arith.constant dense<0.000000e+00> : vector<8x72xf32>
    %74 = tpu.matmul %72, %73, %cst_67 {dimension_numbers = #tpu.dot_dimension_numbers<[1], [0], [0], [1], [0, 0, 1, 1], [], []>} : vector<8x32xf32>, vector<32x72xf32>, vector<8x72xf32> -> vector<8x72xf32>
    %75 = vector.shape_cast %74 : vector<8x72xf32> to vector<1x8x72xf32>
    %cst_68 = arith.constant 0.000000e+00 : f32
    %76 = vector.broadcast %cst_68 : f32 to vector<1x1x72xf32>
    %c0_69 = arith.constant 0 : index
    %c0_70 = arith.constant 0 : index
    %c0_71 = arith.constant 0 : index
    %77 = vector.load %arg6[%c0_69, %c0_70, %c0_71] : memref<1x18x72xf32, #tpu.memory_space<vmem>>, vector<1x1x72xf32>
    tpu.vector_store %arg6[%c0_69, %c0_70, %c0_71], %76 {strides = array<i32>} : memref<1x18x72xf32, #tpu.memory_space<vmem>>, vector<1x1x72xf32>,
    %cst_72 = arith.constant 0.000000e+00 : f32
    %78 = vector.broadcast %cst_72 : f32 to vector<1x1x72xf32>
    %c0_73 = arith.constant 0 : index
    %c17 = arith.constant 17 : index
    %c0_74 = arith.constant 0 : index
    %79 = vector.load %arg6[%c0_73, %c17, %c0_74] : memref<1x18x72xf32, #tpu.memory_space<vmem>>, vector<1x1x72xf32>
    tpu.vector_store %arg6[%c0_73, %c17, %c0_74], %78 {strides = array<i32>} : memref<1x18x72xf32, #tpu.memory_space<vmem>>, vector<1x1x72xf32>,
    %80 = vector.extract_strided_slice %75 {offsets = [0, 0, 0], sizes = [1, 1, 72], strides = [1, 1, 1]} : vector<1x8x72xf32> to vector<1x1x72xf32>
    %81 = vector.shape_cast %80 : vector<1x1x72xf32> to vector<1x1x72xf32>
    %82 = vector.broadcast %81 : vector<1x1x72xf32> to vector<1x2x72xf32>
    %c0_75 = arith.constant 0 : index
    %c1_76 = arith.constant 1 : index
    %c0_77 = arith.constant 0 : index
    %83 = vector.load %arg6[%c0_75, %c1_76, %c0_77] : memref<1x18x72xf32, #tpu.memory_space<vmem>>, vector<1x2x72xf32>
    tpu.vector_store %arg6[%c0_75, %c1_76, %c0_77], %82 {strides = array<i32>} : memref<1x18x72xf32, #tpu.memory_space<vmem>>, vector<1x2x72xf32>,
    %84 = vector.extract_strided_slice %75 {offsets = [0, 1, 0], sizes = [1, 1, 72], strides = [1, 1, 1]} : vector<1x8x72xf32> to vector<1x1x72xf32>
    %85 = vector.shape_cast %84 : vector<1x1x72xf32> to vector<1x1x72xf32>
    %86 = vector.broadcast %85 : vector<1x1x72xf32> to vector<1x2x72xf32>
    %c0_78 = arith.constant 0 : index
    %c3_79 = arith.constant 3 : index
    %c0_80 = arith.constant 0 : index
    %87 = vector.load %arg6[%c0_78, %c3_79, %c0_80] : memref<1x18x72xf32, #tpu.memory_space<vmem>>, vector<1x2x72xf32>
    tpu.vector_store %arg6[%c0_78, %c3_79, %c0_80], %86 {strides = array<i32>} : memref<1x18x72xf32, #tpu.memory_space<vmem>>, vector<1x2x72xf32>,
    %88 = vector.extract_strided_slice %75 {offsets = [0, 2, 0], sizes = [1, 1, 72], strides = [1, 1, 1]} : vector<1x8x72xf32> to vector<1x1x72xf32>
    %89 = vector.shape_cast %88 : vector<1x1x72xf32> to vector<1x1x72xf32>
    %90 = vector.broadcast %89 : vector<1x1x72xf32> to vector<1x2x72xf32>
    %c0_81 = arith.constant 0 : index
    %c5_82 = arith.constant 5 : index
    %c0_83 = arith.constant 0 : index
    %91 = vector.load %arg6[%c0_81, %c5_82, %c0_83] : memref<1x18x72xf32, #tpu.memory_space<vmem>>, vector<1x2x72xf32>
    tpu.vector_store %arg6[%c0_81, %c5_82, %c0_83], %90 {strides = array<i32>} : memref<1x18x72xf32, #tpu.memory_space<vmem>>, vector<1x2x72xf32>,
    %92 = vector.extract_strided_slice %75 {offsets = [0, 3, 0], sizes = [1, 1, 72], strides = [1, 1, 1]} : vector<1x8x72xf32> to vector<1x1x72xf32>
    %93 = vector.shape_cast %92 : vector<1x1x72xf32> to vector<1x1x72xf32>
    %94 = vector.broadcast %93 : vector<1x1x72xf32> to vector<1x2x72xf32>
    %c0_84 = arith.constant 0 : index
    %c7_85 = arith.constant 7 : index
    %c0_86 = arith.constant 0 : index
    %95 = vector.load %arg6[%c0_84, %c7_85, %c0_86] : memref<1x18x72xf32, #tpu.memory_space<vmem>>, vector<1x2x72xf32>
    tpu.vector_store %arg6[%c0_84, %c7_85, %c0_86], %94 {strides = array<i32>} : memref<1x18x72xf32, #tpu.memory_space<vmem>>, vector<1x2x72xf32>,
    %96 = vector.extract_strided_slice %75 {offsets = [0, 4, 0], sizes = [1, 1, 72], strides = [1, 1, 1]} : vector<1x8x72xf32> to vector<1x1x72xf32>
    %97 = vector.shape_cast %96 : vector<1x1x72xf32> to vector<1x1x72xf32>
    %98 = vector.broadcast %97 : vector<1x1x72xf32> to vector<1x2x72xf32>
    %c0_87 = arith.constant 0 : index
    %c9_88 = arith.constant 9 : index
    %c0_89 = arith.constant 0 : index
    %99 = vector.load %arg6[%c0_87, %c9_88, %c0_89] : memref<1x18x72xf32, #tpu.memory_space<vmem>>, vector<1x2x72xf32>
    tpu.vector_store %arg6[%c0_87, %c9_88, %c0_89], %98 {strides = array<i32>} : memref<1x18x72xf32, #tpu.memory_space<vmem>>, vector<1x2x72xf32>,
    %100 = vector.extract_strided_slice %75 {offsets = [0, 5, 0], sizes = [1, 1, 72], strides = [1, 1, 1]} : vector<1x8x72xf32> to vector<1x1x72xf32>
    %101 = vector.shape_cast %100 : vector<1x1x72xf32> to vector<1x1x72xf32>
    %102 = vector.broadcast %101 : vector<1x1x72xf32> to vector<1x2x72xf32>
    %c0_90 = arith.constant 0 : index
    %c11 = arith.constant 11 : index
    %c0_91 = arith.constant 0 : index
    %103 = vector.load %arg6[%c0_90, %c11, %c0_91] : memref<1x18x72xf32, #tpu.memory_space<vmem>>, vector<1x2x72xf32>
    tpu.vector_store %arg6[%c0_90, %c11, %c0_91], %102 {strides = array<i32>} : memref<1x18x72xf32, #tpu.memory_space<vmem>>, vector<1x2x72xf32>,
    %104 = vector.extract_strided_slice %75 {offsets = [0, 6, 0], sizes = [1, 1, 72], strides = [1, 1, 1]} : vector<1x8x72xf32> to vector<1x1x72xf32>
    %105 = vector.shape_cast %104 : vector<1x1x72xf32> to vector<1x1x72xf32>
    %106 = vector.broadcast %105 : vector<1x1x72xf32> to vector<1x2x72xf32>
    %c0_92 = arith.constant 0 : index
    %c13 = arith.constant 13 : index
    %c0_93 = arith.constant 0 : index
    %107 = vector.load %arg6[%c0_92, %c13, %c0_93] : memref<1x18x72xf32, #tpu.memory_space<vmem>>, vector<1x2x72xf32>
    tpu.vector_store %arg6[%c0_92, %c13, %c0_93], %106 {strides = array<i32>} : memref<1x18x72xf32, #tpu.memory_space<vmem>>, vector<1x2x72xf32>,
    %108 = vector.extract_strided_slice %75 {offsets = [0, 7, 0], sizes = [1, 1, 72], strides = [1, 1, 1]} : vector<1x8x72xf32> to vector<1x1x72xf32>
    %109 = vector.shape_cast %108 : vector<1x1x72xf32> to vector<1x1x72xf32>
    %110 = vector.broadcast %109 : vector<1x1x72xf32> to vector<1x2x72xf32>
    %c0_94 = arith.constant 0 : index
    %c15 = arith.constant 15 : index
    %c0_95 = arith.constant 0 : index
    %111 = vector.load %arg6[%c0_94, %c15, %c0_95] : memref<1x18x72xf32, #tpu.memory_space<vmem>>, vector<1x2x72xf32>
    tpu.vector_store %arg6[%c0_94, %c15, %c0_95], %110 {strides = array<i32>} : memref<1x18x72xf32, #tpu.memory_space<vmem>>, vector<1x2x72xf32>,
    %c0_96 = arith.constant 0 : index
    %c0_97 = arith.constant 0 : index
    %c0_98 = arith.constant 0 : index
    %112 = vector.load %arg6[%c0_96, %c0_97, %c0_98] : memref<1x18x72xf32, #tpu.memory_space<vmem>>, vector<1x16x72xf32>
    %c0_99 = arith.constant 0 : index
    %c1_100 = arith.constant 1 : index
    %c0_101 = arith.constant 0 : index
    %113 = vector.load %arg6[%c0_99, %c1_100, %c0_101] : memref<1x18x72xf32, #tpu.memory_space<vmem>>, vector<1x16x72xf32>
    %c0_102 = arith.constant 0 : index
    %c2_103 = arith.constant 2 : index
    %c0_104 = arith.constant 0 : index
    %114 = vector.load %arg6[%c0_102, %c2_103, %c0_104] : memref<1x18x72xf32, #tpu.memory_space<vmem>>, vector<1x16x72xf32>
    %115 = tpu.concatenate %112, %113, %114 in 2 : vector<1x16x72xf32>, vector<1x16x72xf32>, vector<1x16x72xf32> -> vector<1x16x216xf32>
    %116 = vector.shape_cast %115 : vector<1x16x216xf32> to vector<16x216xf32>
    %c280 = arith.constant 280 : index
    %c0_105 = arith.constant 0 : index
    %117 = vector.load %arg2[%c280, %c0_105] : memref<504x96xf32, #tpu.memory_space<vmem>>, vector<216x16xf32>
    %cst_106 = arith.constant dense<0.000000e+00> : vector<16x16xf32>
    %118 = tpu.matmul %116, %117, %cst_106 {dimension_numbers = #tpu.dot_dimension_numbers<[1], [0], [0], [1], [0, 0, 1, 1], [], []>} : vector<16x216xf32>, vector<216x16xf32>, vector<16x16xf32> -> vector<16x16xf32>
    %c496 = arith.constant 496 : index
    %c0_107 = arith.constant 0 : index
    %119 = vector.load %arg2[%c496, %c0_107] : memref<504x96xf32, #tpu.memory_space<vmem>>, vector<1x16xf32>
    %120 = vector.broadcast %119 : vector<1x16xf32> to vector<16x16xf32>
    %121 = arith.addf %118, %120 : vector<16x16xf32>
    %122 = arith.negf %121 : vector<16x16xf32>
    %123 = math.exp %122 : vector<16x16xf32>
    %cst_108 = arith.constant 1.000000e+00 : f32
    %124 = vector.broadcast %cst_108 : f32 to vector<16x16xf32>
    %125 = arith.addf %124, %123 : vector<16x16xf32>
    %126 = arith.divf %124, %125 : vector<16x16xf32>
    %c0_109 = arith.constant 0 : index
    %c0_110 = arith.constant 0 : index
    %127 = vector.load %arg3[%c0_109, %c0_110] : memref<16x16xf32, #tpu.memory_space<vmem>>, vector<16x16xf32>
    tpu.vector_store %arg3[%c0_109, %c0_110], %126 {strides = array<i32>} : memref<16x16xf32, #tpu.memory_space<vmem>>, vector<16x16xf32>,
    return
  }
  func.func @transform_0(%arg0: i32) -> (i32, i32, i32) {
    %c0_i32 = arith.constant 0 : i32
    %c0_i32_0 = arith.constant 0 : i32
    %c0_i32_1 = arith.constant 0 : i32
    return %arg0, %c0_i32, %c0_i32_0 : i32, i32, i32
  }
  func.func @transform_1(%arg0: i32) -> (i32, i32) {
    %c0_i32 = arith.constant 0 : i32
    %c0_i32_0 = arith.constant 0 : i32
    %c0_i32_1 = arith.constant 0 : i32
    return %c0_i32, %c0_i32_0 : i32, i32
  }
  func.func @transform_2(%arg0: i32) -> (i32, i32) {
    %c0_i32 = arith.constant 0 : i32
    %c0_i32_0 = arith.constant 0 : i32
    return %arg0, %c0_i32 : i32, i32
  }
}

</mosaic_0001>

<bundles_post_ra>
// kernel: decoder_forward.1
= control target key start
LH: loop header
LB: loop body
LE: loop exit
PB: predicated region body
PF: predicated region fallthrough
CT: control target
= control target key end

     0   :  { %7 = vsyncpa [#allocation6], 0  ;;  %s1660_s0 = inlined_call_operand.vmem [shape: f32[2,1,16], index: 0, kind: input, shape index: {}]   ;;  %s1661_s1 = inlined_call_operand.vmem [shape: f32[504,96], index: 1, kind: input, shape index: {}]   ;;  %s1662_s2 = inlined_call_operand.hbm [shape: f32[32,16], index: 2, kind: output, shape index: {}]  }
   0x1   :  { %9 = vsyncpa [#allocation6 + $0x1], 0  ;;  %s1270_s9 = smov 0   ;;  %s1272_s10 = smov 0  }
   0x2   :  { %s1274_s11 = smov 0   ;;  %s1276_s12 = smov 0  }
   0x3 LB: > { %s1291_s13 = sadd.s32 4294967295, %s1239_s12   ;;  %s894_s14 = sadd.s32 4294967294, %s1239_s12   ;;  %s1239_s12 = sphi %s1276_s12, %s1668_s12   ;;  %s1235_s11 = sphi %s1274_s11, %s1667_s11   ;;  %s1231_s10 = sphi %s1272_s10, %s1666_s10   ;;  %s1227_s9 = sphi %s1270_s9, %s1665_s9  }
   0x4   : > { %s1295_s15 = sadd.s32 1, %s1239_s12   ;;  %s69_s16 = sadd.s32 1, %s1235_s11 }
   0x5   : > { %s66_s17 = ssub.s32 %s1239_s12, %s1295_s15  ;;  %p79_p0 = scmp.ne.s32.totalorder %s1235_s11, %s1231_s10 }
   0x6   : > { %p67_p1 = scmp.eq.s32.totalorder %s66_s17, 0  ;;  %p80_p2 = scmp.eq.s32.totalorder %s1291_s13, 1 }
   0x7   : > { %p85_p3 = scmp.ne.s32.totalorder %s1231_s10, %s1227_s9  ;;  %p86_p4 = scmp.eq.s32.totalorder %s894_s14, 1 }
   0x8   : > { %s1306_s18 = scalar_select %p67_p1, %s1235_s11, %s69_s16  }
   0x9   : > { %p1308_p5 = por %p80_p2, %p79_p0  ;;  %p1312_p6 = por %p86_p4, %p85_p3 }
   0xa   : > { %p897_p7 = scmp.ge.s32.totalorder %s1239_s12, 1  ;;  %p113_p8 = scmp.lt.s32.totalorder %s1239_s12, 3 }
   0xc   : > { %p114_p9 = pnand %p897_p7, %p113_p8 }
   0xd   : > { %v138_v0 = vld [vmem:[%s1661_s1] sm:$0xff] (!%p114_p9)  ;;  %v139_v1 = vld [vmem:[%s1661_s1 + $0x8] sm:$0xff] (!%p114_p9)  ;;  %p133_p10 = scmp.lt.s32.totalorder (!%p114_p9), %s1291_s13, 1  ;;  %v1241_v2 = vmov (!%p114_p9), 0.0|0.0   ;;  %vm1242_vm0 = vmmov (!%p114_p9), 0   ;;  %v1243_v4 = vmov (!%p114_p9), 0.0   ;;  %v414_v62 = vlaneseq (!%p114_p9) }
   0xe   : > { %117 = sbr.rel (%p114_p9) target bundleno = 1857 (0x741), region = 28  ;;  %1033 = vmatprep.subr.bf16.mxu1 (!%p114_p9), %v1241_v2  ;;  %v1034_v3 = vpack.c.bf16 (!%p114_p9), %v139_v1, %v138_v0  ;;  %958 = vmatprep.mubr.msk.f32.mxu1 (!%p114_p9), %vm1242_vm0, %v1243_v4  ;;  %vm141_vm1 = vcmask (!%p114_p9), 130048   ;;  %vm215_vm2 = vcmask (!%p114_p9), 188416   ;;  %v140_v6 = vld [vmem:[%s1661_s1 + $0x10] sm:$0x1] (!%p114_p9)  ;;  %v247_v10 = vld [vmem:[%s1661_s1 + $0x18] sm:$0xff] (!%p114_p9) }
   0xf   : > { %1036 = vmatprep.subr.bf16.mxu0 (!%p114_p9), %v1241_v2  ;;  %979 = vmatprep.mubr.msk.f32.mxu0 (!%p114_p9), %vm1242_vm0, %v1243_v4  ;;  %216 = vst.msk [vmem:[#allocation2] sm:$0x1] (!%p114_p9), %vm215_vm2, %v1243_v4  ;;  %217 = vst.msk [vmem:[#allocation2 + $0x5] sm:$0x1] (!%p114_p9), %vm215_vm2, %v1243_v4  ;;  %v248_v11 = vld [vmem:[%s1661_s1 + $0x20] sm:$0xff] (!%p114_p9)  ;;  %v249_v12 = vld [vmem:[%s1661_s1 + $0x28] sm:$0xff] (!%p114_p9) }
  0x10   : > { %1035 = vmatpush3.bf16.msra.mxu1 (!%p114_p9), %v1034_v3  ;;  %s1244_s14 = smov (!%p114_p9), 56   ;;  %s1245_s16 = smov (!%p114_p9), 104   ;;  %v1037_v13 = vpack.c.bf16 (!%p114_p9), %v248_v11, %v247_v10  ;;  %v250_v14 = vld [vmem:[%s1661_s1 + $0x30] sm:$0xff] (!%p114_p9)  ;;  %v251_v16 = vld [vmem:[%s1661_s1 + $0x38] sm:$0xff] (!%p114_p9)  ;;  %v252_v17 = vld [vmem:[%s1661_s1 + $0x40] sm:$0xff] (!%p114_p9)  ;;  %vm243_vm3 = vcmask (!%p114_p9), 195584  }
  0x11   : > { %1078 = vmatprep.subr.bf16.mxu1 (!%p114_p9), %v1241_v2  ;;  %v1040_v15 = vpack.c.bf16 (!%p114_p9), %v250_v14, %v249_v12  ;;  %s1246_s26 = smov (!%p114_p9), 80   ;;  %v1043_v18 = vpack.c.bf16 (!%p114_p9), %v252_v17, %v251_v16  ;;  %v253_v19 = vld [vmem:[%s1661_s1 + $0x48] sm:$0xff] (!%p114_p9)  ;;  %v254_v20 = vld [vmem:[%s1661_s1 + $0x50] sm:$0xff] (!%p114_p9)  ;;  %v255_v24 = vld [vmem:[%s1661_s1 + $0x58] sm:$0xff] (!%p114_p9)  ;;  %s1247_s5 = smov (!%p114_p9), 48   ;;  %vm245_vm4 = vcmask (!%p114_p9), 392192  }
  0x12   : > { %1038 = vmatpush3.bf16.msra.mxu0 (!%p114_p9), %v1037_v13  ;;  %v1046_v21 = vpack.c.bf16 (!%p114_p9), %v254_v20, %v253_v19  ;;  %s1248_s6 = smov (!%p114_p9), 24   ;;  %vm261_vm5 = vcmask (!%p114_p9), 588800   ;;  %v336_v33 = vld [vmem:[%s1661_s1 + $0x68] sm:$0xff] (!%p114_p9)  ;;  %v337_v34 = vld [vmem:[%s1661_s1 + $0x70] sm:$0xff] (!%p114_p9)  ;;  %v900_v36 = vld [vmem:[%s1661_s1 + $0x60] ss:$0 sm:$0xff] (!%p114_p9) }
  0x13   : > { %1039 = vmatprep.subr.bf16.mxu0 (!%p114_p9), %v1241_v2  ;;  %v1049_v35 = vpack.c.bf16 (!%p114_p9), %v337_v34, %v336_v33  ;;  %vm411_vm6 = vcmask (!%p114_p9), 319488   ;;  %v450_v41 = vld [vmem:[%s1661_s1 + $0x78] sm:$0xff] (!%p114_p9)  ;;  %v451_v42 = vld [vmem:[%s1661_s1 + $0x80] sm:$0xff] (!%p114_p9)  ;;  %v452_v43 = vld [vmem:[%s1661_s1 + $0x88] sm:$0xff] (!%p114_p9)  ;;  %v1448_v63 = vshrl.u32 (!%p114_p9), %v414_v62, 7  ;;  %vm418_vm7 = vcmask (!%p114_p9), 320512  }
  0x14   : > { %412 = vst.msk [vmem:[#allocation3] sm:$0x1] (!%p114_p9), %vm411_vm6, %v1243_v4  ;;  %413 = vst.msk [vmem:[#allocation3 + $0x9] sm:$0x1] (!%p114_p9), %vm411_vm6, %v1243_v4  ;;  %v1052_v44 = vpack.c.bf16 (!%p114_p9), %v451_v42, %v450_v41  ;;  %v453_v45 = vld [vmem:[%s1661_s1 + $0x90] sm:$0xff] (!%p114_p9)  ;;  %v454_v47 = vld [vmem:[%s1661_s1 + $0x98] sm:$0xff] (!%p114_p9) }
  0x15   : > { %s134_s25 = scalar_select %p133_p10, %s1291_s13, 1  ;;  %v1055_v46 = vpack.c.bf16 %v453_v45, %v452_v43  ;;  %v455_v48 = vld [vmem:[%s1661_s1 + $0xa0] sm:$0xff]  ;;  %v456_v50 = vld [vmem:[%s1661_s1 + $0xa8] sm:$0xff]  ;;  %v457_v51 = vld [vmem:[%s1661_s1 + $0xb0] sm:$0xff]  ;;  %v416_v0 = vsub.s32 0, %v1448_v63  ;;  %v422_v1 = vsub.s32 1, %v1448_v63 }
  0x16   : > { %1041 = vmatpush3.bf16.msra.mxu0 %v1040_v15  ;;  %v1058_v49 = vpack.c.bf16 %v455_v48, %v454_v47  ;;  %v1061_v52 = vpack.c.bf16 %v457_v51, %v456_v50  ;;  %v458_v53 = vld [vmem:[%s1661_s1 + $0xb8] sm:$0xff]  ;;  %v459_v54 = vld [vmem:[%s1661_s1 + $0xc0] sm:$0xff]  ;;  %v460_v56 = vld [vmem:[%s1661_s1 + $0xc8] sm:$0xff]  ;;  %v427_v3 = vsub.s32 2, %v1448_v63  ;;  %s1249_s7 = smov 40   ;;  %vm446_vm8 = vcmask 326656  }
  0x17   : > { %s135_s28 = scalar_lea.vmem %s1660_s0, %s134_s25  ;;  %1042 = vmatprep.subr.bf16.mxu0 %v1241_v2  ;;  %v1064_v55 = vpack.c.bf16 %v459_v54, %v458_v53  ;;  %v461_v57 = vld [vmem:[%s1661_s1 + $0xd0] sm:$0xff]  ;;  %v462_v59 = vld [vmem:[%s1661_s1 + $0xd8] sm:$0xff]  ;;  %v463_v60 = vld [vmem:[%s1661_s1 + $0xe0] sm:$0xff]  ;;  %vm448_vm9 = vcmask 654336   ;;  %vm470_vm10 = vcmask 982016   ;;  %vm549_vm11 = vcmask 261120  }
  0x18   : > { %v137_v5 = vld [vmem:[%s135_s28] sm:$0x1]  ;;  %v1067_v58 = vpack.c.bf16 %v461_v57, %v460_v56  ;;  %v1070_v61 = vpack.c.bf16 %v463_v60, %v462_v59  ;;  %v545_v15 = vld [vmem:[%s1661_s1 + $0xf8] sm:$0xff]  ;;  %vm623_vm12 = vcmask 581632   ;;  %v695_v33 = vld [vmem:[%s1661_s1 + $0x128] sm:$0xff]  ;;  %vm630_vm13 = vcmask 582656  }
  0x19   : > { %959 = vmatmul.mubr.msk.f32.vlgmr.msra.gmra.mrb[0].mxu1 %vm141_vm1, %v137_v5  ;;  %v432_v5 = vsub.s32 3, %v1448_v63  ;;  %v546_v16 = vld [vmem:[%s1661_s1 + $0x100] sm:$0xff]  ;;  %624 = vst.msk [vmem:[#allocation4] sm:$0x1] %vm623_vm12, %v1243_v4  ;;  %625 = vst.msk [vmem:[#allocation4 + $0x11] sm:$0x1] %vm623_vm12, %v1243_v4 }
  0x1a   : > { %1044 = vmatpush3.bf16.msra.mxu0 %v1043_v18  ;;  %v1073_v20 = vpack.c.bf16 %v546_v16, %v545_v15  ;;  %v700_v41 = vld [vmem:[%s1661_s1 + $0x150] sm:$0xff]  ;;  %v701_v43 = vld [vmem:[%s1661_s1 + $0x158] sm:$0xff]  ;;  %v706_v50 = vld [vmem:[%s1661_s1 + $0x180] sm:$0xff]  ;;  %v659_v15 = vsub.s32 6, %v1448_v63  ;;  %v664_v16 = vsub.s32 7, %v1448_v63  ;;  %s1250_s23 = smov 72  }
  0x1b   : > { %1045 = vmatprep.subr.bf16.mxu0 %v1241_v2  ;;  %v704_v47 = vld [vmem:[%s1661_s1 + $0x170] sm:$0xff]  ;;  %v710_v56 = vld [vmem:[%s1661_s1 + $0x1a0] sm:$0xff]  ;;  %s1251_s24 = smov 16   ;;  %vm725_vm14 = vcmask 719872   ;;  %s130_s28 = sand.u32 1, %s1231_s10  }
  0x1c   : > { %v708_v53 = vld [vmem:[%s1661_s1 + $0x190] sm:$0xff]  ;;  %v714_v62 = vld [vmem:[%s1661_s1 + $0x1c0] sm:$0xff]  ;;  %s898_s29 = sshll.u32 %s130_s28, 4  ;;  %s916_s30 = sshll.u32 %s1291_s13, 8 }
  0x1d   : > { %v712_v59 = vld [vmem:[%s1661_s1 + $0x1b0] sm:$0xff]  ;;  %s132_s3 = scalar_lea.vmem [#allocation5], %s898_s29  ;;  %s1619_s8 = scalar_lea.sflag [#allocation6], %s130_s28 }
  0x1e   : > { %1047 = vmatpush3.bf16.msra.mxu0 %v1046_v21  ;;  %s835_s4 = sshll.u32 %s132_s3, 4  ;;  %s1616_s4 = int_to_ptr.vmem [resolvable:$true] %s835_s4 }
  0x1f   : > { %977 = vmatprep.subr.mxu0 %v1243_v4  ;;  %s1177_s13 = scalar_lea.vmem %s1616_s4, 256 }
  0x20   : > { %p1178_p11 = scmp.ne.s32.totalorder %s1616_s4, %s1177_s13 }
  0x22   : > { %978 = vmatpush3.msra.mxu0 %v255_v24  ;;  %v548_v24 = vld [vmem:[%s1661_s1 + $0x110] sm:$0xff]  ;;  %p1179_p12 = pnand %p1178_p11, %p1308_p5 }
  0x23   : > { %1048 = vmatprep.subr.bf16.mxu0 %v1241_v2 }
  0x24   : > { %p1180_p13 = pneg %p1179_p12 }
  0xec   : > { %v211_v7 = vpop.f32.mrb[0].mxu1 }
  0xed   : > { %v212_v8 = vadd.f32 %v211_v7, %v140_v6  ;;  %v960_v9 = vpop.f32.mrb[1].mxu1  ;;  %v464_v6 = vld [vmem:[%s1661_s1 + $0xe8] sm:$0xff] }
  0xef   : > { %218 = vst.msk [vmem:[#allocation2 + $0x1] sm:$0x1] %vm215_vm2, %v212_v8  ;;  %228 = vrot.lane.b32.xlu1 %v212_v8, %s1244_s14  ;;  %220 = vrot.lane.b32.xlu0 %v212_v8, %s1245_s16  ;;  %s1252_s14 = smov [#allocation5]  }
  0xf0   : > { %s1181_s16 = sshll.u32 %s1252_s14, 4  ;;  %s1182_s16 = int_to_ptr.vmem [resolvable:$false] %s1181_s16 }
  0xf1   : > { %s1183_s17 = scalar_lea.vmem %s1182_s16, 512  ;;  %p1184_p0 = scmp.lt.s32.totalorder %s1616_s4, %s1182_s16 }
  0xf2   : > { %p1185_p1 = scmp.lt.s32.totalorder %s1183_s17, %s1177_s13 }
  0xf3   : > { %224 = vrot.lane.b32.xlu0 %v212_v8, %s1246_s26 }
  0xf4   : > { %p1186_p2 = por %p1185_p1, %p1184_p0 }
  0xf6   : > { %p1187_p3 = pnand %p1186_p2, %p1180_p13 }
 0x161   : > { %v229_v22 = vpop.permute.xlu1 %228  ;;  %v221_v23 = vpop.permute.xlu0 %220 }
 0x162   : > { %231 = vst.msk [vmem:[#allocation2 + $0x4] sm:$0x1] %vm215_vm2, %v229_v22  ;;  %223 = vst.msk [vmem:[#allocation2 + $0x2] sm:$0x1] %vm215_vm2, %v221_v23  ;;  %v547_v23 = vld [vmem:[%s1661_s1 + $0x108] sm:$0xff] }
 0x165   : > { %v225_v25 = vpop.permute.xlu0 %224 }
 0x166   : > { %227 = vst.msk [vmem:[#allocation2 + $0x3] sm:$0x1] %vm215_vm2, %v225_v25  ;;  %v1076_v25 = vpack.c.bf16 %v548_v24, %v547_v23 }
 0x16d   : > { %v234_v26 = vld [vmem:[#allocation2 + $0x2] sm:$0xf] }
 0x16e   : > { %v233_v27 = vld [vmem:[#allocation2 + $0x1] sm:$0xf]  ;;  %240 = vrot.lane.b32.xlu0 %v234_v26, %s1247_s5  ;;  %v903_v26 = vld [vmem:[%s1661_s1 + $0xf0] ss:$0 sm:$0xff] }
 0x16f   : > { %236 = vrot.lane.b32.xlu1 %v233_v27, %s1248_s6  ;;  %v232_v30 = vld [vmem:[#allocation2] sm:$0xf] }
 0x1e0   : > { %v241_v28 = vpop.permute.xlu0 %240 }
 0x1e1   : > { %v237_v29 = vpop.permute.xlu1 %236 }
 0x1e2   : > { %v244_v31 = vsel %vm243_vm3, %v232_v30, %v237_v29 }
 0x1e3   : > { %v246_v32 = vsel %vm245_vm4, %v244_v31, %v241_v28  ;;  %v693_v31 = vld [vmem:[%s1661_s1 + $0x118] sm:$0xff] }
 0x1e4   : > { %980 = vmatmul.mubr.msk.f32.vlgmr.msra.gmra.mrb[0].mxu0 %vm261_vm5, %v246_v32  ;;  %v694_v32 = vld [vmem:[%s1661_s1 + $0x120] sm:$0xff] }
 0x1e5   : > { %986 = vmatprep.mubr.msk.f32.mxu0 %vm1242_vm0, %v1243_v4  ;;  %1050 = vmatpush3.bf16.msra.mxu0 %v1049_v35  ;;  %v1079_v34 = vpack.c.bf16 %v694_v32, %v693_v31  ;;  %v696_v35 = vld [vmem:[%s1661_s1 + $0x130] sm:$0xff] }
 0x1e6   : > { %1051 = vmatprep.subr.bf16.mxu0 %v1241_v2 }
 0x1e7   : > { %1080 = vmatpush1.bf16.msra.mxu1 %v1079_v34 }
 0x1e8   : > { %1081 = vmatprep.subr.bf16.mxu1 %v1241_v2 }
 0x2b7   : > { %v331_v37 = vpop.f32.mrb[0].mxu0 }
 0x2b8   : > { %v332_v38 = vadd.f32 %v900_v36, %v331_v37  ;;  %v981_v39 = vpop.f32.mrb[1].mxu0  ;;  %v1082_v36 = vpack.c.bf16 %v696_v35, %v695_v33  ;;  %v697_v37 = vld [vmem:[%s1661_s1 + $0x138] sm:$0xff]  ;;  %v906_v35 = vld [vmem:[%s1661_s1 + $0x1f0] ss:$0 sm:$0xff] }
 0x2ba   : > { %v335_v40 = vmax.f32 %v332_v38, 0.0  ;;  %v698_v38 = vld [vmem:[%s1661_s1 + $0x140] sm:$0xff]  ;;  %1083 = vmatpush1.bf16.msra.mxu1 %v1082_v36 }
 0x2bb   : > { %v1085_v39 = vpack.c.bf16 %v698_v38, %v697_v37  ;;  %1084 = vmatprep.subr.bf16.mxu1 %v1241_v2 }
 0x2bc   : > { %987 = vmatmul.mubr.msk.f32.vlgmr.msra.gmra.mrb[2].mxu0 %vm141_vm1, %v335_v40  ;;  %v699_v40 = vld [vmem:[%s1661_s1 + $0x148] sm:$0xff] }
 0x2bd   : > { %1019 = vmatprep.mubr.msk.f32.mxu0 %vm1242_vm0, %v1243_v4  ;;  %1053 = vmatpush3.bf16.msra.mxu0 %v1052_v44  ;;  %v1088_v42 = vpack.c.bf16 %v700_v41, %v699_v40  ;;  %v702_v44 = vld [vmem:[%s1661_s1 + $0x160] sm:$0xff] }
 0x2be   : > { %1054 = vmatprep.subr.bf16.mxu0 %v1241_v2  ;;  %1086 = vmatpush1.bf16.msra.mxu1 %v1085_v39  ;;  %v1091_v45 = vpack.c.bf16 %v702_v44, %v701_v43 }
 0x2bf   : > { %1087 = vmatprep.subr.bf16.mxu1 %v1241_v2 }
 0x2c1   : > { %1056 = vmatpush3.bf16.msra.mxu0 %v1055_v46  ;;  %v703_v46 = vld [vmem:[%s1661_s1 + $0x168] sm:$0xff] }
 0x2c2   : > { %1057 = vmatprep.subr.bf16.mxu0 %v1241_v2  ;;  %1089 = vmatpush1.bf16.msra.mxu1 %v1088_v42  ;;  %v1094_v48 = vpack.c.bf16 %v704_v47, %v703_v46 }
 0x2c3   : > { %1090 = vmatprep.subr.bf16.mxu1 %v1241_v2 }
 0x2c5   : > { %1059 = vmatpush3.bf16.msra.mxu0 %v1058_v49  ;;  %v705_v49 = vld [vmem:[%s1661_s1 + $0x178] sm:$0xff] }
 0x2c6   : > { %1060 = vmatprep.subr.bf16.mxu0 %v1241_v2  ;;  %1092 = vmatpush1.bf16.msra.mxu1 %v1091_v45  ;;  %v1097_v51 = vpack.c.bf16 %v706_v50, %v705_v49 }
 0x2c7   : > { %1093 = vmatprep.subr.bf16.mxu1 %v1241_v2 }
 0x2c9   : > { %1062 = vmatpush3.bf16.msra.mxu0 %v1061_v52  ;;  %v707_v52 = vld [vmem:[%s1661_s1 + $0x188] sm:$0xff] }
 0x2ca   : > { %1063 = vmatprep.subr.bf16.mxu0 %v1241_v2  ;;  %1095 = vmatpush1.bf16.msra.mxu1 %v1094_v48  ;;  %v1100_v54 = vpack.c.bf16 %v708_v53, %v707_v52 }
 0x2cb   : > { %1096 = vmatprep.subr.bf16.mxu1 %v1241_v2 }
 0x2cd   : > { %1065 = vmatpush3.bf16.msra.mxu0 %v1064_v55  ;;  %v709_v55 = vld [vmem:[%s1661_s1 + $0x198] sm:$0xff] }
 0x2ce   : > { %1066 = vmatprep.subr.bf16.mxu0 %v1241_v2  ;;  %1098 = vmatpush1.bf16.msra.mxu1 %v1097_v51  ;;  %v1103_v57 = vpack.c.bf16 %v710_v56, %v709_v55 }
 0x2cf   : > { %1099 = vmatprep.subr.bf16.mxu1 %v1241_v2 }
 0x2d1   : > { %1068 = vmatpush3.bf16.msra.mxu0 %v1067_v58  ;;  %v711_v58 = vld [vmem:[%s1661_s1 + $0x1a8] sm:$0xff] }
 0x2d2   : > { %1069 = vmatprep.subr.bf16.mxu0 %v1241_v2  ;;  %1101 = vmatpush1.bf16.msra.mxu1 %v1100_v54  ;;  %v1106_v60 = vpack.c.bf16 %v712_v59, %v711_v58 }
 0x2d3   : > { %1102 = vmatprep.subr.bf16.mxu1 %v1241_v2 }
 0x2d5   : > { %1071 = vmatpush3.bf16.msra.mxu0 %v1070_v61  ;;  %v713_v61 = vld [vmem:[%s1661_s1 + $0x1b8] sm:$0xff] }
 0x2d6   : > { %1017 = vmatprep.subr.mxu0 %v1243_v4  ;;  %1104 = vmatpush1.bf16.msra.mxu1 %v1103_v57 }
 0x2d7   : > { %1105 = vmatprep.subr.bf16.mxu1 %v1241_v2 }
 0x2d9   : > { %1018 = vmatpush3.msra.mxu0 %v464_v6  ;;  %v1109_v6 = vpack.c.bf16 %v714_v62, %v713_v61 }
 0x2da   : > { %1072 = vmatprep.subr.bf16.mxu0 %v1241_v2  ;;  %1107 = vmatpush1.bf16.msra.mxu1 %v1106_v60 }
 0x2db   : > { %1108 = vmatprep.subr.bf16.mxu1 %v1241_v2 }
 0x2de   : > { %1110 = vmatpush1.bf16.msra.mxu1 %v1109_v6 }
 0x2df   : > { %1111 = vmatprep.subr.bf16.mxu1 %v1241_v2 }
 0x38f   : > { %v407_v7 = vpop.f32.mrb[2].mxu0 }
 0x390   : > { %v417_v8 = vrot.slane %v407_v7, %v416_v0  ;;  %v423_v9 = vrot.slane %v407_v7, %v422_v1  ;;  %v428_v10 = vrot.slane %v407_v7, %v427_v3  ;;  %v433_v11 = vrot.slane %v407_v7, %v432_v5  ;;  %v988_v12 = vpop.f32.mrb[3].mxu0  ;;  %v715_v7 = vld [vmem:[%s1661_s1 + $0x1c8] sm:$0xff] }
 0x392   : > { %419 = vst.msk [vmem:[#allocation3 + $0x1] sm:$0x3] %vm418_vm7, %v417_v8  ;;  %424 = vst.msk [vmem:[#allocation3 + $0x3] sm:$0x3] %vm418_vm7, %v423_v9  ;;  %v716_v8 = vld [vmem:[%s1661_s1 + $0x1d0] sm:$0xff] }
 0x393   : > { %429 = vst.msk [vmem:[#allocation3 + $0x5] sm:$0x3] %vm418_vm7, %v428_v10  ;;  %434 = vst.msk [vmem:[#allocation3 + $0x7] sm:$0x3] %vm418_vm7, %v433_v11  ;;  %v1112_v9 = vpack.c.bf16 %v716_v8, %v715_v7  ;;  %v717_v10 = vld [vmem:[%s1661_s1 + $0x1d8] sm:$0xff]  ;;  %v718_v11 = vld [vmem:[%s1661_s1 + $0x1e0] sm:$0xff] }
 0x394   : > { %v1115_v12 = vpack.c.bf16 %v718_v11, %v717_v10 }
 0x395   : > { %1113 = vmatpush1.bf16.msra.mxu1 %v1112_v9 }
 0x396   : > { %1114 = vmatprep.subr.bf16.mxu1 %v1241_v2 }
 0x399   : > { %1116 = vmatpush1.bf16.msra.mxu1 %v1115_v12 }
 0x39a   : > { %v437_v13 = vld [vmem:[#allocation3 + $0x2] sm:$0xff]  ;;  %784 = vmatprep.subr.mxu1 %v1243_v4 }
 0x39b   : > { %v436_v14 = vld [vmem:[#allocation3 + $0x1] sm:$0xff]  ;;  %443 = vrot.lane.b32.xlu0 %v437_v13, %s1246_s26  ;;  %v649_v13 = vsub.s32 4, %v1448_v63 }
 0x39c   : > { %439 = vrot.lane.b32.xlu1 %v436_v14, %s1249_s7  ;;  %v435_v19 = vld [vmem:[#allocation3] sm:$0xff]  ;;  %v654_v14 = vsub.s32 5, %v1448_v63  ;;  %s1614_s7 = scalar_lea.hbm %s1662_s2, %s916_s30 }
 0x40d   : > { %v444_v17 = vpop.permute.xlu0 %443 }
 0x40e   : > { %v440_v18 = vpop.permute.xlu1 %439 }
 0x40f   : > { %v447_v21 = vsel %vm446_vm8, %v435_v19, %v440_v18 }
 0x410   : > { %v449_v22 = vsel %vm448_vm9, %v447_v21, %v444_v17  ;;  %v719_v17 = vld [vmem:[%s1661_s1 + $0x1e8] sm:$0xff] }
 0x411   : > { %1020 = vmatmul.mubr.msk.f32.vlgmr.msra.gmra.mrb[4].mxu0 %vm470_vm10, %v449_v22  ;;  %785 = vmatpush1.msra.mxu1 %v719_v17 }
 0x412   : > { %1074 = vmatpush3.bf16.msra.mxu0 %v1073_v20  ;;  %1030 = vmatprep.mubr.msk.f32.mxu0 %vm1242_vm0, %v1243_v4 }
 0x413   : > { %1075 = vmatprep.subr.bf16.mxu0 %v1241_v2 }
 0x416   : > { %1077 = vmatpush3.bf16.msra.mxu0 %v1076_v25 }
 0x4e4   : > { %v540_v27 = vpop.f32.mrb[4].mxu0 }
 0x4e5   : > { %v541_v28 = vadd.f32 %v903_v26, %v540_v27  ;;  %v1021_v29 = vpop.f32.mrb[5].mxu0 }
 0x4e7   : > { %v544_v30 = vmax.f32 %v541_v28, 0.0 }
 0x4e9   : > { %1031 = vmatmul.mubr.msk.f32.vlgmr.msra.gmra.mrb[6].mxu0 %vm549_vm11, %v544_v30 }
 0x5bc   : > { %v619_v18 = vpop.f32.mrb[6].mxu0 }
 0x5bd   : > { %v629_v2 = vrot.slane %v619_v18, %v416_v0  ;;  %v635_v4 = vrot.slane %v619_v18, %v422_v1  ;;  %v640_v19 = vrot.slane %v619_v18, %v427_v3  ;;  %v645_v20 = vrot.slane %v619_v18, %v432_v5  ;;  %v1032_v21 = vpop.f32.mrb[7].mxu0 }
 0x5be   : > { %v650_v22 = vrot.slane %v619_v18, %v649_v13  ;;  %v655_v23 = vrot.slane %v619_v18, %v654_v14  ;;  %v660_v24 = vrot.slane %v619_v18, %v659_v15  ;;  %v665_v25 = vrot.slane %v619_v18, %v664_v16 }
 0x5bf   : > { %631 = vst.msk [vmem:[#allocation4 + $0x1] sm:$0x3] %vm630_vm13, %v629_v2  ;;  %636 = vst.msk [vmem:[#allocation4 + $0x3] sm:$0x3] %vm630_vm13, %v635_v4 }
 0x5c0   : > { %641 = vst.msk [vmem:[#allocation4 + $0x5] sm:$0x3] %vm630_vm13, %v640_v19  ;;  %646 = vst.msk [vmem:[#allocation4 + $0x7] sm:$0x3] %vm630_vm13, %v645_v20 }
 0x5c1   : > { %651 = vst.msk [vmem:[#allocation4 + $0x9] sm:$0x3] %vm630_vm13, %v650_v22  ;;  %656 = vst.msk [vmem:[#allocation4 + $0xb] sm:$0x3] %vm630_vm13, %v655_v23 }
 0x5c2   : > { %661 = vst.msk [vmem:[#allocation4 + $0xd] sm:$0x3] %vm630_vm13, %v660_v24  ;;  %666 = vst.msk [vmem:[#allocation4 + $0xf] sm:$0x3] %vm630_vm13, %v665_v25 }
 0x5c7   : > { %v669_v63 = vld [vmem:[#allocation4 + $0x1] sm:$0xff] }
 0x5c8   : > { %v671_v0 = vld [vmem:[#allocation4 + $0x2] sm:$0xff]  ;;  %675 = vrot.lane.b32.xlu1 %v669_v63, %s1250_s23 }
 0x5c9   : > { %683 = vrot.lane.b32.xlu0 %v671_v0, %s1251_s24  ;;  %v670_v1 = vld [vmem:[#allocation4 + $0x9] sm:$0xff]  ;;  %v667_v26 = vld [vmem:[#allocation4] sm:$0xff] }
 0x5ca   : > { %v672_v3 = vld [vmem:[#allocation4 + $0xa] sm:$0xff] }
 0x5cb   : > { %v668_v31 = vld [vmem:[#allocation4 + $0x8] sm:$0xff] }
 0x5cc   : > { %677 = vrot.lane.b32.xlu1 %v670_v1, %s1250_s23 }
 0x5cd   : > { %685 = vrot.lane.b32.xlu0 %v672_v3, %s1251_s24 }
 0x63a   : > { %v676_v5 = vpop.permute.xlu1 %675 }
 0x63b   : > { %v684_v27 = vpop.permute.xlu0 %683  ;;  %v689_v28 = vsel %vm261_vm5, %v667_v26, %v676_v5 }
 0x63c   : > { %v691_v29 = vsel %vm141_vm1, %v676_v5, %v684_v27 }
 0x63d   : > { %907 = vmatprep.mubr.msk.f32.mxu1 %vm725_vm14, %v691_v29 }
 0x63e   : > { %797 = vmatmul.mubr.f32.vlgmr.msra.gmra.mrb[2].mxu1 %v689_v28  ;;  %v678_v30 = vpop.permute.xlu1 %677 }
 0x63f   : > { %v686_v32 = vpop.permute.xlu0 %685  ;;  %v690_v33 = vsel %vm261_vm5, %v668_v31, %v678_v30 }
 0x640   : > { %v692_v34 = vsel %vm141_vm1, %v678_v30, %v686_v32 }
 0x641   : > { %908 = vmatprep.mubr.msk.f32.mxu1 %vm725_vm14, %v692_v34 }
 0x642   : > { %802 = vmatmul.mubr.f32.gmra.mrb[4].mxu1 %v690_v33 }
 0x711   : > { %v798_v36 = vpop.f32.mrb[2].mxu1 }
 0x712   : > { %v799_v37 = vadd.f32 %v906_v35, %v798_v36  ;;  %v800_v38 = vpop.f32.mrb[3].mxu1 }
 0x714   : > { %v909_v39 = vmul.f32 -1.442695, %v799_v37 }
 0x715   : > { %v803_v40 = vpop.f32.mrb[4].mxu1 }
 0x716   : > { %1169 = vpow2.f32 %v909_v39  ;;  %v804_v41 = vadd.f32 %v906_v35, %v803_v40  ;;  %v805_v42 = vpop.f32.mrb[5].mxu1 }
 0x718   : > { %v910_v43 = vmul.f32 -1.442695, %v804_v41 }
 0x71a   : > { %1171 = vpow2.f32 %v910_v43 }
 0x720   : > { %v1170_v44 = vpop.eup %1169 }
 0x721   : > { %v813_v45 = vadd.f32 1.0, %v1170_v44 }
 0x723   : > { %1173 = vrcp.f32 %v813_v45 }
 0x724   : > { %v1172_v46 = vpop.eup %1171 }
 0x725   : > { %v814_v47 = vadd.f32 1.0, %v1172_v46 }
 0x727   : > { %1175 = vrcp.f32 %v814_v47 }
 0x72d   : > { %v1174_v48 = vpop.eup %1173 }
 0x72e   : > { %819 = vst.msk [vmem:[%s132_s3] sm:$0xff] %vm141_vm1, %v1174_v48 }
 0x731   : > { %v1176_v49 = vpop.eup %1175 }
 0x732   : > { %820 = vst.msk [vmem:[%s132_s3 + $0x8] sm:$0xff] %vm141_vm1, %v1176_v49 }
 0x733   : > { %1190 = shalt.err (!%p1187_p3)
}
 0x734   : > { %s1191_s26 = scalar_lea.hbm %s1614_s7, 256  ;;  %s1195_s23 = scalar_lea.hbm %s1662_s2, 512 }
 0x735   : > { %p1192_p4 = scmp.ne.s32.totalorder %s1614_s7, %s1191_s26  ;;  %p1196_p9 = scmp.lt.u32.totalorder %s1614_s7, %s1662_s2 }
 0x736   : > { %p1197_p10 = scmp.lt.u32.totalorder %s1195_s23, %s1191_s26  ;;  %p1199_p12 = scmp.lt.u32.totalorder %s1191_s26, %s1614_s7 }
 0x737   : > { %p1193_p7 = pnand %p1192_p4, %p1308_p5 }
 0x738   : > { %p1198_p11 = por %p1197_p10, %p1196_p9 }
 0x739   : > { %p1194_p8 = pneg %p1193_p7 }
 0x73a   : > { %p1200_p13 = por %p1199_p12, %p1198_p11 }
 0x73c   : > { %p1201_p0 = pnand %p1200_p13, %p1194_p8 }
 0x73e   : > { %1204 = shalt.err (!%p1201_p0)
}
 0x73f   : > { %s1253_s27 = smov 128   ;;  %s1254_s28 = smov 8  }
 0x740   : > { %1117 = dma.vmem_to_hbm [thread:$0]  (%p1308_p5), %s1616_s4, 256, %s1614_s7, %s1619_s8, %s1253_s27, %s1253_s27, %s1254_s28  }
 0x741 PF: > { %p1123_p1 = scmp.ge.s32.totalorder %s1239_s12, 2  ;;  %s850_s29 = sand.u32 1, %s1227_s9  }
 0x742   : > { %s851_s30 = scalar_lea.sflag [#allocation6], %s850_s29 }
 0x743   : > { %p1120_p2 = pnand %p1123_p1, %p1312_p6 }
 0x745   : > { %1222 = dma.done.wait (!%p1120_p2), %s851_s30, 256  }
 0x746   : > { %1224 = vsyncadd (!%p1120_p2), %s851_s30, 4294967040  ;;  %p12_p3 = scmp.ge.s32.totalorder %s1295_s15, 4   ;;  %s1665_s9 = smov %s1231_s10 }
 0x747   : > { %s1666_s10 = smov %s1235_s11  ;;  %s1667_s11 = smov %s1306_s18 }
 0x748   : > { %s1668_s12 = smov %s1295_s15  ;;  %14 = sbr.rel (!%p12_p3) target bundleno = 3 (0x3), region = 63 }
 0x74f   :  { %856 = vsyncpa [#allocation6], 1 }
 0x750   :  { %858 = vsyncpa [#allocation6 + $0x1], 1 }

</bundles_post_ra>
